<compile_context>
chip_gen: v7x
topology: tpu7x:2x2x1
jax: 0.10.0
libtpu: 0.0.40
codegen_flags: <defaults>
</compile_context>

<pallas_src>
import jax
import jax.numpy as jnp
from jax.experimental import pallas as pl
from jax.experimental.pallas import tpu as pltpu


def znet_kernel(theta_ref, x_ref, o_ref):
    # theta_ref lives in SMEM (shape (1,)); x_ref / o_ref are lane-dense VMEM tiles.
    scale = 2.0 * theta_ref[0]                       # folded once on the scalar unit
    o_ref[...] = (scale * x_ref[...]).astype(o_ref.dtype)  # one broadcast vmul per vreg


def znet_forward(theta, t, x, *, lane_width=512, max_tile_rows=1024):
    """Pallas equivalent of ZNet.forward(t, x) == 2 * theta * x.

    `t` (shape (..., 1)) is accepted for signature parity but, as in the
    reference PyTorch module, it is not used in the computation.
    """
    del t  # unused by the reference forward

    orig_shape = x.shape
    dtype = x.dtype
    n_elems = x.size

    # Lane-dense re-layout: flatten and fold into (rows, lane_width), with
    # lane_width a multiple of 128.  Pad only to a multiple of one
    # (8, lane_width) row group so the jnp.pad copy (an extra HBM pass outside
    # the kernel) is bounded by < 4096 elements and usually skipped entirely.
    C = lane_width
    row_group = 8 * C
    total_padded = pl.cdiv(n_elems, row_group) * row_group
    rows = total_padded // C                       # multiple of 8

    xf = x.reshape(-1)
    if total_padded != n_elems:
        xf = jnp.pad(xf, (0, total_padded - n_elems))
    x2 = xf.reshape(rows, C)

    # Row tile: ~2 MiB for f32 when the input is large, otherwise the whole
    # (8-row-aligned) array in a single block.  Ragged last tile is fine.
    tile_rows = min(max_tile_rows, rows)
    grid = (pl.cdiv(rows, tile_rows),)
    bytes_io = 2 * total_padded * x2.dtype.itemsize  # read + write

    out2 = pl.pallas_call(
        znet_kernel,
        out_shape=jax.ShapeDtypeStruct((rows, C), dtype),
        grid_spec=pltpu.PrefetchScalarGridSpec(
            num_scalar_prefetch=0,
            grid=grid,
            in_specs=[
                # scalar parameter theta -> SMEM, passed whole (no tiling)
                pl.BlockSpec(memory_space=pltpu.MemorySpace.SMEM),
                # x -> large lane-dense row tiles in VMEM
                pl.BlockSpec((tile_rows, C), lambda i: (i, 0)),
            ],
            out_specs=pl.BlockSpec((tile_rows, C), lambda i: (i, 0)),
        ),
        compiler_params=pltpu.CompilerParams(
            dimension_semantics=("parallel",),
            vmem_limit_bytes=32 * 1024 * 1024,
        ),
        cost_estimate=pl.CostEstimate(
            flops=total_padded, transcendentals=0, bytes_accessed=bytes_io
        ),
    )(theta, x2)

    return out2.reshape(-1)[:n_elems].reshape(orig_shape)


if __name__ == "__main__":
    key = jax.random.PRNGKey(0)
    k_t, k_x = jax.random.split(key)

    # Deterministic parameter init, matching torch.nn.Parameter(torch.tensor([-1.0]))
    theta = jnp.array([-1.0], dtype=jnp.float32)

    # Small shapes consistent with forward: t (..., 1), x (..., n)
    batch, seq, n = 2, 8, 32
    t = jax.random.uniform(k_t, (batch, seq, 1), dtype=jnp.float32)
    x = jax.random.normal(k_x, (batch, seq, n), dtype=jnp.float32)

    out = znet_forward(theta, t, x)
    out = jax.block_until_ready(out)

    # correctness check against the plain-JAX reference of the torch forward
    ref = 2.0 * theta[0] * x
    assert out.shape == x.shape
    assert jnp.allclose(out, ref, atol=1e-6), "mismatch vs reference"

    print("KERNEL_OK")
</pallas_src>

<mosaic_0001>
module attributes {stable_mosaic.version = 11 : i64} {
  func.func @znet_kernel(%arg0: i32, %arg1: memref<1xf32, #tpu.memory_space<smem>>, %arg2: memref<8x512xf32, #tpu.memory_space<vmem>>, %arg3: memref<8x512xf32, #tpu.memory_space<vmem>>) attributes {dimension_semantics = [#tpu.dimension_semantics<parallel>], iteration_bounds = array<i64: 1>, scalar_prefetch = 0 : i64, scratch_operands = 0 : i64, tpu.core_type = #tpu.core_type<tc>, window_params = [{transform_indices = @transform_0, window_bounds = array<i64: 1>}, {transform_indices = @transform_1, window_bounds = array<i64: 8, 512>}, {transform_indices = @transform_2, window_bounds = array<i64: 8, 512>}]} {
    %c0 = arith.constant 0 : index
    %0 = memref.load %arg1[%c0] : memref<1xf32, #tpu.memory_space<smem>>
    %cst = arith.constant 2.000000e+00 : f32
    %1 = arith.mulf %cst, %0 : f32
    %c0_0 = arith.constant 0 : index
    %c0_1 = arith.constant 0 : index
    %2 = vector.load %arg2[%c0_0, %c0_1] : memref<8x512xf32, #tpu.memory_space<vmem>>, vector<8x512xf32>
    %3 = vector.broadcast %1 : f32 to vector<8x512xf32>
    %4 = arith.mulf %3, %2 : vector<8x512xf32>
    %c0_2 = arith.constant 0 : index
    %c0_3 = arith.constant 0 : index
    %5 = vector.load %arg3[%c0_2, %c0_3] : memref<8x512xf32, #tpu.memory_space<vmem>>, vector<8x512xf32>
    tpu.vector_store %arg3[%c0_2, %c0_3], %4 {strides = array<i32>} : memref<8x512xf32, #tpu.memory_space<vmem>>, vector<8x512xf32>,
    return
  }
  func.func @transform_0(%arg0: i32) -> i32 {
    %c0_i32 = arith.constant 0 : i32
    %c0_i32_0 = arith.constant 0 : i32
    return %c0_i32 : i32
  }
  func.func @transform_1(%arg0: i32) -> (i32, i32) {
    %c0_i32 = arith.constant 0 : i32
    %c0_i32_0 = arith.constant 0 : i32
    return %arg0, %c0_i32 : i32, i32
  }
  func.func @transform_2(%arg0: i32) -> (i32, i32) {
    %c0_i32 = arith.constant 0 : i32
    %c0_i32_0 = arith.constant 0 : i32
    return %arg0, %c0_i32 : i32, i32
  }
}

</mosaic_0001>

<bundles_post_ra>
// kernel: tpu_custom_call.1
= control target key start
LH: loop header
LB: loop body
LE: loop exit
PB: predicated region body
PF: predicated region fallthrough
CT: control target
= control target key end

     0   :  { %8 = vsyncpa [#allocation4], 0  ;;  %s149_s0 = inlined_call_operand.<no memory space> [shape: f32[1], index: 0, kind: input, shape index: {}]   ;;  %s150_s1 = inlined_call_operand.hbm [shape: f32[8,512], index: 1, kind: input, shape index: {}]   ;;  %s151_s2 = inlined_call_operand.hbm [shape: f32[8,512], index: 2, kind: output, shape index: {}]  }
   0x1   :  { %9 = vsyncpa [#allocation5], 0  ;;  %s105_s9 = smov [#allocation3]   ;;  %s57_s13 = scalar_lea.hbm %s150_s1, 512 }
   0x2   :  { %s18_s10 = sshll.u32 %s105_s9, 4  ;;  %p58_p0 = scmp.ne.s32.totalorder %s150_s1, %s57_s13  ;;  %s19_s10 = int_to_ptr.vmem [resolvable:$true] %s18_s10 }
   0x3   :  { %p61_p1 = scmp.lt.u32.totalorder %s57_s13, %s150_s1 }
   0x5   :  { %p63_p2 = pnand %p61_p1, %p58_p0 }
   0x7   :  { %66 = shalt.err (!%p63_p2)
}
   0x8   :  { %s67_s18 = scalar_lea.vmem %s19_s10, 512  ;;  %p72_p4 = scmp.lt.s32.totalorder %s19_s10, %s19_s10 }
   0x9   :  { %p68_p3 = scmp.ne.s32.totalorder %s19_s10, %s67_s18  ;;  %p73_p5 = scmp.lt.s32.totalorder %s67_s18, %s67_s18 }
   0xb   :  { %p74_p6 = por %p73_p5, %p72_p4 }
   0xd   :  { %p75_p7 = pnand %p74_p6, %p68_p3 }
   0xf   :  { %78 = shalt.err (!%p75_p7)
}
  0x10   :  { %21 = dma.hbm_to_vmem [thread:$0]  %s150_s1, 512, %s19_s10, [#allocation4]  }
  0x11   :  { %101 = dma.done.wait [#allocation4], 512  }
  0x12   :  { %102 = vsyncadd [#allocation4], 4294966784  ;;  %s26_s23 = smul.f32 2.0, %s149_s0  ;;  %s106_s24 = smov [#allocation6]   ;;  %v27_v1 = vld [vmem:[#allocation3] sm:$0xff]  ;;  %v28_v2 = vld [vmem:[#allocation3 + $0x8] sm:$0xff] }
  0x13   :  { %s46_s25 = sshll.u32 %s106_s24, 4  ;;  %v29_v3 = vld [vmem:[#allocation3 + $0x10] sm:$0xff]  ;;  %v30_v7 = vld [vmem:[#allocation3 + $0x18] sm:$0xff]  ;;  %s47_s25 = int_to_ptr.vmem [resolvable:$true] %s46_s25 }
  0x14   :  { %v31_v0 = vstv %s26_s23  ;;  %s79_s1 = scalar_lea.vmem %s47_s25, 512  ;;  %p84_p9 = scmp.lt.s32.totalorder %s47_s25, %s47_s25 }
  0x15   :  { %v32_v4 = vmul.f32 %v31_v0, %v27_v1  ;;  %v33_v5 = vmul.f32 %v31_v0, %v28_v2  ;;  %v34_v6 = vmul.f32 %v31_v0, %v29_v3  ;;  %v35_v8 = vmul.f32 %v31_v0, %v30_v7  ;;  %p80_p8 = scmp.ne.s32.totalorder %s47_s25, %s79_s1  ;;  %p85_p10 = scmp.lt.s32.totalorder %s79_s1, %s79_s1 }
  0x17   :  { %36 = vst [vmem:[#allocation6] sm:$0xff] %v32_v4  ;;  %37 = vst [vmem:[#allocation6 + $0x8] sm:$0xff] %v33_v5  ;;  %p86_p11 = por %p85_p10, %p84_p9 }
  0x18   :  { %38 = vst [vmem:[#allocation6 + $0x10] sm:$0xff] %v34_v6  ;;  %39 = vst [vmem:[#allocation6 + $0x18] sm:$0xff] %v35_v8 }
  0x19   :  { %p87_p12 = pnand %p86_p11, %p80_p8 }
  0x1b   :  { %90 = shalt.err (!%p87_p12)
}
  0x1c   :  { %s91_s27 = scalar_lea.hbm %s151_s2, 512 }
  0x1d   :  { %p92_p13 = scmp.ne.s32.totalorder %s151_s2, %s91_s27  ;;  %p95_p0 = scmp.lt.u32.totalorder %s91_s27, %s151_s2 }
  0x1f   :  { %p97_p1 = pnand %p95_p0, %p92_p13 }
  0x21   :  { %100 = shalt.err (!%p97_p1)
}
  0x22   :  { %49 = dma.vmem_to_hbm [thread:$0]  %s47_s25, 512, %s151_s2, [#allocation5]  }
  0x23   :  { %103 = dma.done.wait [#allocation5], 512  }
  0x24   :  { %104 = vsyncadd [#allocation5], 4294966784 }
  0x25   :  { %53 = vsyncpa [#allocation4], 1 }
  0x26   :  { %54 = vsyncpa [#allocation5], 1 }

</bundles_post_ra>
